<compile_context>
chip_gen: v7x
topology: tpu7x:2x2x1
jax: 0.10.0
libtpu: 0.0.40
codegen_flags: <defaults>
</compile_context>

<pallas_src>
import functools

import numpy as np
import jax
import jax.numpy as jnp
from jax.experimental import pallas as pl
from jax.experimental.pallas import tpu as pltpu


# ------------------------------- Fused kernel ------------------------------- #

def _fused_mhfca_kernel(q_ref, kv_ref, wq_t_ref, wkv_t_ref, wo_t_ref, o_ref,
                        *, head_num, head_dim):
    E = head_num * head_dim
    q = q_ref[0]                        # [Tq, E]
    kv = kv_ref[0]                      # [Tk, E]

    # Projections. Scale D*sqrt(D) is pre-folded into wq_t; the circular flip P
    # is pre-folded into the K half of wkv_t; heads are contiguous lane slices.
    q_p = jnp.dot(q, wq_t_ref[...], preferred_element_type=jnp.float32)     # [Tq, E]
    kv_p = jnp.dot(kv, wkv_t_ref[...], preferred_element_type=jnp.float32)  # [Tk, 2E]
    k_p = kv_p[:, :E]                   # [Tk, E]
    v_p = kv_p[:, E:]                   # [Tk, E]

    # Per-head attention, accumulated straight through the output projection:
    #   concat_h(attn_h @ V_h) @ Wo^T == sum_h (attn_h @ V_h) @ Wo^T[h*D:(h+1)*D, :]
    acc = jnp.zeros(o_ref.shape[1:], jnp.float32)                           # [Tq, E]
    for h in range(head_num):           # static unroll (head_num is small)
        lo = h * head_dim
        hi = lo + head_dim
        qh = q_p[:, lo:hi]              # [Tq, D]
        kh = k_p[:, lo:hi]              # [Tk, D]  (flip already folded)
        vh = v_p[:, lo:hi]              # [Tk, D]

        energy = jax.lax.dot_general(
            qh, kh, (((1,), (1,)), ((), ())),
            preferred_element_type=jnp.float32)                             # [Tq, Tk]

        m = jnp.max(energy, axis=-1, keepdims=True)
        e = jnp.exp(energy - m)
        denom = jnp.sum(e, axis=-1, keepdims=True)
        attn = e * pl.reciprocal(denom, approx=True)                        # EUP slot

        out_h = jnp.dot(attn, vh, preferred_element_type=jnp.float32)       # [Tq, D]
        acc = acc + jnp.dot(out_h, wo_t_ref[lo:hi, :],
                            preferred_element_type=jnp.float32)             # [Tq, E]

    o_ref[0] = acc.astype(o_ref.dtype)


def mhfca_forward(q, kv, wq_t, wkv_t, wo_t, head_num):
    """q: [B, Tq, E], kv: [B, Tk, E] -> [B, Tq, E].  One fused pallas_call."""
    B, Tq, E = q.shape
    Tk = kv.shape[1]
    D = E // head_num
    kernel = functools.partial(_fused_mhfca_kernel, head_num=head_num, head_dim=D)
    return pl.pallas_call(
        kernel,
        out_shape=jax.ShapeDtypeStruct((B, Tq, E), q.dtype),
        grid=(B,),
        in_specs=[
            pl.BlockSpec((1, Tq, E), lambda b: (b, 0, 0)),       # q (per batch)
            pl.BlockSpec((1, Tk, E), lambda b: (b, 0, 0)),       # kv (per batch)
            pl.BlockSpec((E, E), lambda b: (0, 0)),              # wq^T (resident)
            pl.BlockSpec((E, 2 * E), lambda b: (0, 0)),          # [wk^T | wv^T]
            pl.BlockSpec((E, E), lambda b: (0, 0)),              # wo^T
        ],
        out_specs=pl.BlockSpec((1, Tq, E), lambda b: (b, 0, 0)),
        compiler_params=pltpu.CompilerParams(
            dimension_semantics=("parallel",),                   # B>=2 -> both TCs on v7x
            vmem_limit_bytes=32 * 1024 * 1024,
        ),
    )(q, kv, wq_t, wkv_t, wo_t)


# ------------------------------ Module wrapper ------------------------------ #

class MultiHeadFrequencyCrossAttentionPallas:
    def __init__(self, embedding_dim, head_num, key):
        assert embedding_dim % head_num == 0
        self.head_num = head_num
        self.embedding_dim = embedding_dim
        self.head_dim = embedding_dim // head_num
        self.dk = float(self.head_dim) ** 0.5          # module multiplies by this

        # Deterministic parameter init (nn.Linear weights are [out, in]).
        ks = jax.random.split(key, 4)
        bound = 1.0 / (embedding_dim ** 0.5)
        init = lambda k: jax.random.uniform(
            k, (embedding_dim, embedding_dim), jnp.float32, -bound, bound)
        self.wq, self.wk, self.wv, self.wo = (init(k) for k in ks)

        H, D, E = head_num, self.head_dim, embedding_dim
        d_idx = np.arange(D)

        # Channel permutation '(d h)' -> '(h d)': new channel h*D+d = old d*H+h.
        perm_hd = np.empty(E, np.int32)
        # Same, composed with the circular flip d -> (-d) % D   (folds P into wk).
        perm_k = np.empty(E, np.int32)
        for h in range(H):
            perm_hd[h * D + d_idx] = d_idx * H + h
            perm_k[h * D + d_idx] = ((-d_idx) % D) * H + h

        scale = float(D) * self.dk                     # D from FFT identity, dk from module

        wq_np = np.asarray(self.wq)
        wk_np = np.asarray(self.wk)
        wv_np = np.asarray(self.wv)
        wo_np = np.asarray(self.wo)

        # Precomputed, permuted, transposed weights used by the fused kernel.
        self.wq_t = jnp.asarray((scale * wq_np[perm_hd, :]).T)                 # [E, E]
        self.wkv_t = jnp.asarray(
            np.concatenate([wk_np[perm_k, :].T, wv_np[perm_hd, :].T], axis=1))  # [E, 2E]
        self.wo_t = jnp.asarray(wo_np.T)                                       # [E, E]
        # The merged head layout '(h d)' matches wo's original input layout, so
        # wo needs no permutation.

    def __call__(self, q, kv):
        return mhfca_forward(q, kv, self.wq_t, self.wkv_t, self.wo_t, self.head_num)


# ------------------------- NumPy reference (with FFT) ----------------------- #

def reference_forward(q, kv, wq, wk, wv, wo, head_num):
    q = q @ wq.T
    k = kv @ wk.T
    v = kv @ wv.T
    B, Tq, E = q.shape
    H = head_num
    D = E // H

    def split(x):  # b t (d h) -> b h t d
        b, t, _ = x.shape
        return x.reshape(b, t, D, H).transpose(0, 3, 1, 2)

    Q, K, V = split(q), split(k), split(v)
    Qf = np.fft.fftn(Q, axes=(-2, -1))
    Kf = np.fft.fftn(K, axes=(-2, -1))
    energy = np.einsum('bhid,bhjd->bhij', Qf, Kf) * (D ** 0.5)
    energy = np.fft.ifftn(energy, axes=(-2, -1)).real
    energy = energy - energy.max(-1, keepdims=True)
    attn = np.exp(energy)
    attn = attn / attn.sum(-1, keepdims=True)
    out = np.einsum('bhij,bhjd->bhid', attn, V)
    out = out.transpose(0, 2, 1, 3).reshape(B, Tq, E)   # b h t d -> b t (h d)
    return out @ wo.T


# ---------------------------------- Main ------------------------------------ #

if __name__ == "__main__":
    B, Tq, Tk, E, H = 2, 8, 16, 32, 4

    root = jax.random.PRNGKey(0)
    k_q, k_kv, k_params = jax.random.split(root, 3)
    q = jax.random.normal(k_q, (B, Tq, E), jnp.float32)
    kv = jax.random.normal(k_kv, (B, Tk, E), jnp.float32)

    module = MultiHeadFrequencyCrossAttentionPallas(E, H, k_params)

    out = module(q, kv)
    out = jax.block_until_ready(out)

    ref = reference_forward(
        np.asarray(q), np.asarray(kv),
        np.asarray(module.wq), np.asarray(module.wk),
        np.asarray(module.wv), np.asarray(module.wo), H)

    np.testing.assert_allclose(np.asarray(out), ref, rtol=2e-3, atol=2e-3)
    print("KERNEL_OK")
</pallas_src>

<mosaic_0001>
module attributes {stable_mosaic.version = 11 : i64} {
  func.func @_fused_mhfca_kernel(%arg0: i32, %arg1: memref<1x8x32xf32, #tpu.memory_space<vmem>>, %arg2: memref<1x16x32xf32, #tpu.memory_space<vmem>>, %arg3: memref<32x32xf32, #tpu.memory_space<vmem>>, %arg4: memref<32x64xf32, #tpu.memory_space<vmem>>, %arg5: memref<32x32xf32, #tpu.memory_space<vmem>>, %arg6: memref<1x8x32xf32, #tpu.memory_space<vmem>>) attributes {dimension_semantics = [#tpu.dimension_semantics<parallel>], iteration_bounds = array<i64: 2>, scalar_prefetch = 0 : i64, scratch_operands = 0 : i64, tpu.core_type = #tpu.core_type<tc>, window_params = [{transform_indices = @transform_0, window_bounds = array<i64: 1, 8, 32>}, {transform_indices = @transform_1, window_bounds = array<i64: 1, 16, 32>}, {pipeline_mode = #tpu.pipeline_mode<synchronous>, transform_indices = @transform_2, window_bounds = array<i64: 32, 32>}, {pipeline_mode = #tpu.pipeline_mode<synchronous>, transform_indices = @transform_3, window_bounds = array<i64: 32, 64>}, {pipeline_mode = #tpu.pipeline_mode<synchronous>, transform_indices = @transform_4, window_bounds = array<i64: 32, 32>}, {transform_indices = @transform_5, window_bounds = array<i64: 1, 8, 32>}]} {
    %c0 = arith.constant 0 : index
    %c0_0 = arith.constant 0 : index
    %c0_1 = arith.constant 0 : index
    %0 = vector.load %arg1[%c0, %c0_0, %c0_1] : memref<1x8x32xf32, #tpu.memory_space<vmem>>, vector<1x8x32xf32>
    %1 = vector.shape_cast %0 : vector<1x8x32xf32> to vector<8x32xf32>
    %c0_2 = arith.constant 0 : index
    %c0_3 = arith.constant 0 : index
    %c0_4 = arith.constant 0 : index
    %2 = vector.load %arg2[%c0_2, %c0_3, %c0_4] : memref<1x16x32xf32, #tpu.memory_space<vmem>>, vector<1x16x32xf32>
    %3 = vector.shape_cast %2 : vector<1x16x32xf32> to vector<16x32xf32>
    %c0_5 = arith.constant 0 : index
    %c0_6 = arith.constant 0 : index
    %4 = vector.load %arg3[%c0_5, %c0_6] : memref<32x32xf32, #tpu.memory_space<vmem>>, vector<32x32xf32>
    %cst = arith.constant dense<0.000000e+00> : vector<8x32xf32>
    %5 = tpu.matmul %1, %4, %cst {dimension_numbers = #tpu.dot_dimension_numbers<[1], [0], [0], [1], [0, 0, 1, 1], [], []>} : vector<8x32xf32>, vector<32x32xf32>, vector<8x32xf32> -> vector<8x32xf32>
    %c0_7 = arith.constant 0 : index
    %c0_8 = arith.constant 0 : index
    %6 = vector.load %arg4[%c0_7, %c0_8] : memref<32x64xf32, #tpu.memory_space<vmem>>, vector<32x64xf32>
    %cst_9 = arith.constant dense<0.000000e+00> : vector<16x64xf32>
    %7 = tpu.matmul %3, %6, %cst_9 {dimension_numbers = #tpu.dot_dimension_numbers<[1], [0], [0], [1], [0, 0, 1, 1], [], []>} : vector<16x32xf32>, vector<32x64xf32>, vector<16x64xf32> -> vector<16x64xf32>
    %8 = vector.extract_strided_slice %7 {offsets = [0, 0], sizes = [16, 32], strides = [1, 1]} : vector<16x64xf32> to vector<16x32xf32>
    %9 = vector.extract_strided_slice %7 {offsets = [0, 32], sizes = [16, 32], strides = [1, 1]} : vector<16x64xf32> to vector<16x32xf32>
    %cst_10 = arith.constant 0.000000e+00 : f32
    %10 = vector.broadcast %cst_10 : f32 to vector<8x32xf32>
    %11 = vector.extract_strided_slice %5 {offsets = [0, 0], sizes = [8, 8], strides = [1, 1]} : vector<8x32xf32> to vector<8x8xf32>
    %12 = vector.extract_strided_slice %8 {offsets = [0, 0], sizes = [16, 8], strides = [1, 1]} : vector<16x32xf32> to vector<16x8xf32>
    %13 = vector.extract_strided_slice %9 {offsets = [0, 0], sizes = [16, 8], strides = [1, 1]} : vector<16x32xf32> to vector<16x8xf32>
    %cst_11 = arith.constant dense<0.000000e+00> : vector<8x16xf32>
    %14 = tpu.matmul %11, %12, %cst_11 {dimension_numbers = #tpu.dot_dimension_numbers<[1], [1], [0], [0], [0, 0, 1, 0], [], []>} : vector<8x8xf32>, vector<16x8xf32>, vector<8x16xf32> -> vector<8x16xf32>
    %cst_12 = arith.constant dense<0xFF800000> : vector<8xf32>
    %15 = vector.multi_reduction <maximumf>, %14, %cst_12 [1] : vector<8x16xf32> to vector<8xf32>
    %16 = vector.shape_cast %15 : vector<8xf32> to vector<8x1xf32>
    %17 = vector.broadcast %16 : vector<8x1xf32> to vector<8x16xf32>
    %18 = arith.subf %14, %17 : vector<8x16xf32>
    %19 = math.exp %18 : vector<8x16xf32>
    %cst_13 = arith.constant dense<0.000000e+00> : vector<8xf32>
    %20 = vector.multi_reduction <add>, %19, %cst_13 [1] : vector<8x16xf32> to vector<8xf32>
    %21 = vector.shape_cast %20 : vector<8xf32> to vector<8x1xf32>
    %22 = tpu.reciprocal %21 {approx = true} : vector<8x1xf32> -> vector<8x1xf32>
    %23 = vector.broadcast %22 : vector<8x1xf32> to vector<8x16xf32>
    %24 = arith.mulf %19, %23 : vector<8x16xf32>
    %cst_14 = arith.constant dense<0.000000e+00> : vector<8x8xf32>
    %25 = tpu.matmul %24, %13, %cst_14 {dimension_numbers = #tpu.dot_dimension_numbers<[1], [0], [0], [1], [0, 0, 1, 1], [], []>} : vector<8x16xf32>, vector<16x8xf32>, vector<8x8xf32> -> vector<8x8xf32>
    %c0_15 = arith.constant 0 : index
    %c0_16 = arith.constant 0 : index
    %26 = vector.load %arg5[%c0_15, %c0_16] : memref<32x32xf32, #tpu.memory_space<vmem>>, vector<8x32xf32>
    %cst_17 = arith.constant dense<0.000000e+00> : vector<8x32xf32>
    %27 = tpu.matmul %25, %26, %cst_17 {dimension_numbers = #tpu.dot_dimension_numbers<[1], [0], [0], [1], [0, 0, 1, 1], [], []>} : vector<8x8xf32>, vector<8x32xf32>, vector<8x32xf32> -> vector<8x32xf32>
    %28 = arith.addf %10, %27 : vector<8x32xf32>
    %29 = vector.extract_strided_slice %5 {offsets = [0, 8], sizes = [8, 8], strides = [1, 1]} : vector<8x32xf32> to vector<8x8xf32>
    %30 = vector.extract_strided_slice %8 {offsets = [0, 8], sizes = [16, 8], strides = [1, 1]} : vector<16x32xf32> to vector<16x8xf32>
    %31 = vector.extract_strided_slice %9 {offsets = [0, 8], sizes = [16, 8], strides = [1, 1]} : vector<16x32xf32> to vector<16x8xf32>
    %cst_18 = arith.constant dense<0.000000e+00> : vector<8x16xf32>
    %32 = tpu.matmul %29, %30, %cst_18 {dimension_numbers = #tpu.dot_dimension_numbers<[1], [1], [0], [0], [0, 0, 1, 0], [], []>} : vector<8x8xf32>, vector<16x8xf32>, vector<8x16xf32> -> vector<8x16xf32>
    %cst_19 = arith.constant dense<0xFF800000> : vector<8xf32>
    %33 = vector.multi_reduction <maximumf>, %32, %cst_19 [1] : vector<8x16xf32> to vector<8xf32>
    %34 = vector.shape_cast %33 : vector<8xf32> to vector<8x1xf32>
    %35 = vector.broadcast %34 : vector<8x1xf32> to vector<8x16xf32>
    %36 = arith.subf %32, %35 : vector<8x16xf32>
    %37 = math.exp %36 : vector<8x16xf32>
    %cst_20 = arith.constant dense<0.000000e+00> : vector<8xf32>
    %38 = vector.multi_reduction <add>, %37, %cst_20 [1] : vector<8x16xf32> to vector<8xf32>
    %39 = vector.shape_cast %38 : vector<8xf32> to vector<8x1xf32>
    %40 = tpu.reciprocal %39 {approx = true} : vector<8x1xf32> -> vector<8x1xf32>
    %41 = vector.broadcast %40 : vector<8x1xf32> to vector<8x16xf32>
    %42 = arith.mulf %37, %41 : vector<8x16xf32>
    %cst_21 = arith.constant dense<0.000000e+00> : vector<8x8xf32>
    %43 = tpu.matmul %42, %31, %cst_21 {dimension_numbers = #tpu.dot_dimension_numbers<[1], [0], [0], [1], [0, 0, 1, 1], [], []>} : vector<8x16xf32>, vector<16x8xf32>, vector<8x8xf32> -> vector<8x8xf32>
    %c8 = arith.constant 8 : index
    %c0_22 = arith.constant 0 : index
    %44 = vector.load %arg5[%c8, %c0_22] : memref<32x32xf32, #tpu.memory_space<vmem>>, vector<8x32xf32>
    %cst_23 = arith.constant dense<0.000000e+00> : vector<8x32xf32>
    %45 = tpu.matmul %43, %44, %cst_23 {dimension_numbers = #tpu.dot_dimension_numbers<[1], [0], [0], [1], [0, 0, 1, 1], [], []>} : vector<8x8xf32>, vector<8x32xf32>, vector<8x32xf32> -> vector<8x32xf32>
    %46 = arith.addf %28, %45 : vector<8x32xf32>
    %47 = vector.extract_strided_slice %5 {offsets = [0, 16], sizes = [8, 8], strides = [1, 1]} : vector<8x32xf32> to vector<8x8xf32>
    %48 = vector.extract_strided_slice %8 {offsets = [0, 16], sizes = [16, 8], strides = [1, 1]} : vector<16x32xf32> to vector<16x8xf32>
    %49 = vector.extract_strided_slice %9 {offsets = [0, 16], sizes = [16, 8], strides = [1, 1]} : vector<16x32xf32> to vector<16x8xf32>
    %cst_24 = arith.constant dense<0.000000e+00> : vector<8x16xf32>
    %50 = tpu.matmul %47, %48, %cst_24 {dimension_numbers = #tpu.dot_dimension_numbers<[1], [1], [0], [0], [0, 0, 1, 0], [], []>} : vector<8x8xf32>, vector<16x8xf32>, vector<8x16xf32> -> vector<8x16xf32>
    %cst_25 = arith.constant dense<0xFF800000> : vector<8xf32>
    %51 = vector.multi_reduction <maximumf>, %50, %cst_25 [1] : vector<8x16xf32> to vector<8xf32>
    %52 = vector.shape_cast %51 : vector<8xf32> to vector<8x1xf32>
    %53 = vector.broadcast %52 : vector<8x1xf32> to vector<8x16xf32>
    %54 = arith.subf %50, %53 : vector<8x16xf32>
    %55 = math.exp %54 : vector<8x16xf32>
    %cst_26 = arith.constant dense<0.000000e+00> : vector<8xf32>
    %56 = vector.multi_reduction <add>, %55, %cst_26 [1] : vector<8x16xf32> to vector<8xf32>
    %57 = vector.shape_cast %56 : vector<8xf32> to vector<8x1xf32>
    %58 = tpu.reciprocal %57 {approx = true} : vector<8x1xf32> -> vector<8x1xf32>
    %59 = vector.broadcast %58 : vector<8x1xf32> to vector<8x16xf32>
    %60 = arith.mulf %55, %59 : vector<8x16xf32>
    %cst_27 = arith.constant dense<0.000000e+00> : vector<8x8xf32>
    %61 = tpu.matmul %60, %49, %cst_27 {dimension_numbers = #tpu.dot_dimension_numbers<[1], [0], [0], [1], [0, 0, 1, 1], [], []>} : vector<8x16xf32>, vector<16x8xf32>, vector<8x8xf32> -> vector<8x8xf32>
    %c16 = arith.constant 16 : index
    %c0_28 = arith.constant 0 : index
    %62 = vector.load %arg5[%c16, %c0_28] : memref<32x32xf32, #tpu.memory_space<vmem>>, vector<8x32xf32>
    %cst_29 = arith.constant dense<0.000000e+00> : vector<8x32xf32>
    %63 = tpu.matmul %61, %62, %cst_29 {dimension_numbers = #tpu.dot_dimension_numbers<[1], [0], [0], [1], [0, 0, 1, 1], [], []>} : vector<8x8xf32>, vector<8x32xf32>, vector<8x32xf32> -> vector<8x32xf32>
    %64 = arith.addf %46, %63 : vector<8x32xf32>
    %65 = vector.extract_strided_slice %5 {offsets = [0, 24], sizes = [8, 8], strides = [1, 1]} : vector<8x32xf32> to vector<8x8xf32>
    %66 = vector.extract_strided_slice %8 {offsets = [0, 24], sizes = [16, 8], strides = [1, 1]} : vector<16x32xf32> to vector<16x8xf32>
    %67 = vector.extract_strided_slice %9 {offsets = [0, 24], sizes = [16, 8], strides = [1, 1]} : vector<16x32xf32> to vector<16x8xf32>
    %cst_30 = arith.constant dense<0.000000e+00> : vector<8x16xf32>
    %68 = tpu.matmul %65, %66, %cst_30 {dimension_numbers = #tpu.dot_dimension_numbers<[1], [1], [0], [0], [0, 0, 1, 0], [], []>} : vector<8x8xf32>, vector<16x8xf32>, vector<8x16xf32> -> vector<8x16xf32>
    %cst_31 = arith.constant dense<0xFF800000> : vector<8xf32>
    %69 = vector.multi_reduction <maximumf>, %68, %cst_31 [1] : vector<8x16xf32> to vector<8xf32>
    %70 = vector.shape_cast %69 : vector<8xf32> to vector<8x1xf32>
    %71 = vector.broadcast %70 : vector<8x1xf32> to vector<8x16xf32>
    %72 = arith.subf %68, %71 : vector<8x16xf32>
    %73 = math.exp %72 : vector<8x16xf32>
    %cst_32 = arith.constant dense<0.000000e+00> : vector<8xf32>
    %74 = vector.multi_reduction <add>, %73, %cst_32 [1] : vector<8x16xf32> to vector<8xf32>
    %75 = vector.shape_cast %74 : vector<8xf32> to vector<8x1xf32>
    %76 = tpu.reciprocal %75 {approx = true} : vector<8x1xf32> -> vector<8x1xf32>
    %77 = vector.broadcast %76 : vector<8x1xf32> to vector<8x16xf32>
    %78 = arith.mulf %73, %77 : vector<8x16xf32>
    %cst_33 = arith.constant dense<0.000000e+00> : vector<8x8xf32>
    %79 = tpu.matmul %78, %67, %cst_33 {dimension_numbers = #tpu.dot_dimension_numbers<[1], [0], [0], [1], [0, 0, 1, 1], [], []>} : vector<8x16xf32>, vector<16x8xf32>, vector<8x8xf32> -> vector<8x8xf32>
    %c24 = arith.constant 24 : index
    %c0_34 = arith.constant 0 : index
    %80 = vector.load %arg5[%c24, %c0_34] : memref<32x32xf32, #tpu.memory_space<vmem>>, vector<8x32xf32>
    %cst_35 = arith.constant dense<0.000000e+00> : vector<8x32xf32>
    %81 = tpu.matmul %79, %80, %cst_35 {dimension_numbers = #tpu.dot_dimension_numbers<[1], [0], [0], [1], [0, 0, 1, 1], [], []>} : vector<8x8xf32>, vector<8x32xf32>, vector<8x32xf32> -> vector<8x32xf32>
    %82 = arith.addf %64, %81 : vector<8x32xf32>
    %c0_36 = arith.constant 0 : index
    %c0_37 = arith.constant 0 : index
    %c0_38 = arith.constant 0 : index
    %83 = vector.load %arg6[%c0_36, %c0_37, %c0_38] : memref<1x8x32xf32, #tpu.memory_space<vmem>>, vector<1x8x32xf32>
    %84 = vector.shape_cast %83 : vector<1x8x32xf32> to vector<8x32xf32>
    %85 = vector.shape_cast %82 : vector<8x32xf32> to vector<1x8x32xf32>
    tpu.vector_store %arg6[%c0_36, %c0_37, %c0_38], %85 {strides = array<i32>} : memref<1x8x32xf32, #tpu.memory_space<vmem>>, vector<1x8x32xf32>,
    return
  }
  func.func @transform_0(%arg0: i32) -> (i32, i32, i32) {
    %c0_i32 = arith.constant 0 : i32
    %c0_i32_0 = arith.constant 0 : i32
    %c0_i32_1 = arith.constant 0 : i32
    return %arg0, %c0_i32, %c0_i32_0 : i32, i32, i32
  }
  func.func @transform_1(%arg0: i32) -> (i32, i32, i32) {
    %c0_i32 = arith.constant 0 : i32
    %c0_i32_0 = arith.constant 0 : i32
    %c0_i32_1 = arith.constant 0 : i32
    return %arg0, %c0_i32, %c0_i32_0 : i32, i32, i32
  }
  func.func @transform_2(%arg0: i32) -> (i32, i32) {
    %c0_i32 = arith.constant 0 : i32
    %c0_i32_0 = arith.constant 0 : i32
    %c0_i32_1 = arith.constant 0 : i32
    return %c0_i32, %c0_i32_0 : i32, i32
  }
  func.func @transform_3(%arg0: i32) -> (i32, i32) {
    %c0_i32 = arith.constant 0 : i32
    %c0_i32_0 = arith.constant 0 : i32
    %c0_i32_1 = arith.constant 0 : i32
    return %c0_i32, %c0_i32_0 : i32, i32
  }
  func.func @transform_4(%arg0: i32) -> (i32, i32) {
    %c0_i32 = arith.constant 0 : i32
    %c0_i32_0 = arith.constant 0 : i32
    %c0_i32_1 = arith.constant 0 : i32
    return %c0_i32, %c0_i32_0 : i32, i32
  }
  func.func @transform_5(%arg0: i32) -> (i32, i32, i32) {
    %c0_i32 = arith.constant 0 : i32
    %c0_i32_0 = arith.constant 0 : i32
    %c0_i32_1 = arith.constant 0 : i32
    return %arg0, %c0_i32, %c0_i32_0 : i32, i32, i32
  }
}

</mosaic_0001>

<bundles_post_ra>
// kernel: tpu_custom_call.1
= control target key start
LH: loop header
LB: loop body
LE: loop exit
PB: predicated region body
PF: predicated region fallthrough
CT: control target
= control target key end

     0   :  { %s2674_s0 = inlined_call_operand.hbm [shape: f32[2,8,32], index: 0, kind: input, shape index: {}]   ;;  %s2675_s1 = inlined_call_operand.hbm [shape: f32[2,16,32], index: 1, kind: input, shape index: {}]   ;;  %s2676_s2 = inlined_call_operand.hbm [shape: f32[32,32], index: 2, kind: input, shape index: {}]   ;;  %s2677_s3 = inlined_call_operand.hbm [shape: f32[32,64], index: 3, kind: input, shape index: {}]   ;;  %s2678_s4 = inlined_call_operand.hbm [shape: f32[32,32], index: 4, kind: input, shape index: {}]   ;;  %s2679_s5 = inlined_call_operand.hbm [shape: f32[2,8,32], index: 5, kind: output, shape index: {}]  }
   0x1   :  { %2685 = sst [smem:[#allocation17_spill]] %s2674_s0 }
   0x2   :  { %10 = vsyncpa [#allocation3], 0 }
   0x3   :  { %12 = vsyncpa [#allocation3 + $0x1], 0 }
   0x4   :  { %13 = vsyncpa [#allocation6], 0 }
   0x5   :  { %15 = vsyncpa [#allocation6 + $0x1], 0 }
   0x6   :  { %16 = vsyncpa [#allocation9], 0 }
   0x7   :  { %17 = vsyncpa [#allocation4], 0 }
   0x8   :  { %19 = vsyncpa [#allocation4 + $0x1], 0  ;;  %s2262_s18 = smov 0   ;;  %s2264_s19 = smov 0  }
   0x9   :  { %s2266_s20 = smov 0   ;;  %s2268_s21 = smov 0  }
   0xa LB: > { %s2283_s22 = sadd.s32 4294967295, %s2212_s21   ;;  %s1610_s23 = sadd.s32 4294967294, %s2212_s21   ;;  %s2212_s21 = sphi %s2268_s21, %s2710_s21   ;;  %s2208_s20 = sphi %s2266_s20, %s2709_s20   ;;  %s2204_s19 = sphi %s2264_s19, %s2708_s19   ;;  %s2200_s18 = sphi %s2262_s18, %s2707_s18  }
   0xb   : > { %p45_p0 = scmp.ne.s32.totalorder %s2204_s19, %s2200_s18  ;;  %p2680_p1 = scmp.eq.s32.totalorder %s2283_s22, 0 }
   0xc   : > { %p164_p3 = scmp.eq.s32.totalorder %s1610_s23, 1  ;;  %p1611_p5 = scmp.ge.s32.totalorder %s2212_s21, 1 }
   0xd   : > { %p2292_p4 = por %p2680_p1, %p45_p0  ;;  %p171_p7 = scmp.lt.s32.totalorder %s2212_s21, 3 }
   0xe   : > { %p2297_p6 = por %p164_p3, %p45_p0  ;;  %s2214_s27 = smov [#allocation7]  }
   0xf   : > { %s2686_s24 = scalar_select %p2292_p4, 1, 0 }
  0x10   : > { %s2687_s25 = scalar_select %p2297_p6, 1, 0 }
  0x11   : > { %p2302_p8 = pnand %p1611_p5, %p171_p7  ;;  %s183_s28 = sshll.u32 %s2214_s27, 4  ;;  %s2306_s28 = int_to_ptr.vmem [resolvable:$true] %s183_s28 }
  0x12   : > { %s2215_s30 = smov [#allocation8]   ;;  %s2216_s7 = smov [#allocation10]  }
  0x13   : > { %s2688_s26 = scalar_select %p2302_p8, 1, 0 }
  0x14   : > { %p1863_p9 = pneg %p2302_p8  ;;  %s196_s6 = sshll.u32 %s2215_s30, 4  ;;  %s2317_s6 = int_to_ptr.vmem [resolvable:$true] %s196_s6 }
  0x15   : > { %s2319_s8 = sshll.u32 %s2216_s7, 4  ;;  %s1990_s11 = scalar_lea.hbm %s2676_s2, 512  ;;  %s210_s8 = int_to_ptr.vmem [resolvable:$true] %s2319_s8 }
  0x16   : > { %p2313_p11 = pnand %p1863_p9, %p2680_p1  ;;  %p1991_p12 = scmp.ne.s32.totalorder %s2676_s2, %s1990_s11 }
  0x17   : > { %p1997_p5 = scmp.lt.u32.totalorder %s1990_s11, %s2676_s2 }
  0x18   : > { %p2329_p13 = pneg %p2313_p11 }
  0x1a   : > { %p1993_p0 = pnand %p2329_p13, %p1991_p12 }
  0x1c   : > { %p1994_p3 = pneg %p1993_p0 }
  0x1e   : > { %p1999_p7 = pnand %p1997_p5, %p1994_p3 }
  0x20   : > { %2002 = shalt.err (!%p1999_p7)
}
  0x21   : > { %s2003_s17 = scalar_lea.vmem %s2306_s28, 512  ;;  %p2011_p2 = scmp.lt.s32.totalorder %s2306_s28, %s2306_s28 }
  0x22   : > { %p2004_p9 = scmp.ne.s32.totalorder %s2306_s28, %s2003_s17  ;;  %p2012_p6 = scmp.lt.s32.totalorder %s2003_s17, %s2003_s17 }
  0x24   : > { %p2006_p10 = pnand %p2004_p9, %p2329_p13  ;;  %p2013_p12 = por %p2012_p6, %p2011_p2 }
  0x26   : > { %p2007_p1 = pneg %p2006_p10 }
  0x28   : > { %p2014_p0 = pnand %p2013_p12, %p2007_p1 }
  0x2a   : > { %2017 = shalt.err (!%p2014_p0)
}
  0x2b   : > { %s2683_s23 = smov 128   ;;  %s2684_s27 = smov 8  }
  0x2c   : > { %1866 = dma.hbm_to_vmem [thread:$0]  (!%p2313_p11), %s2676_s2, 512, %s2306_s28, [#allocation6], %s2683_s23, %s2683_s23, %s2684_s27  }
  0x2d   : > { %s2018_s11 = scalar_lea.hbm %s2677_s3, 512 }
  0x2e   : > { %p2019_p1 = scmp.ne.s32.totalorder %s2677_s3, %s2018_s11  ;;  %p2025_p10 = scmp.lt.u32.totalorder %s2018_s11, %s2677_s3 }
  0x30   : > { %p2021_p2 = pnand %p2019_p1, %p2329_p13 }
  0x32   : > { %p2022_p6 = pneg %p2021_p2 }
  0x34   : > { %p2027_p3 = pnand %p2025_p10, %p2022_p6 }
  0x36   : > { %2030 = shalt.err (!%p2027_p3)
}
  0x37   : > { %s2031_s28 = scalar_lea.vmem %s2317_s6, 512  ;;  %p2039_p12 = scmp.lt.s32.totalorder %s2317_s6, %s2317_s6 }
  0x38   : > { %p2032_p5 = scmp.ne.s32.totalorder %s2317_s6, %s2031_s28  ;;  %p2040_p0 = scmp.lt.s32.totalorder %s2031_s28, %s2031_s28 }
  0x3a   : > { %p2034_p7 = pnand %p2032_p5, %p2329_p13  ;;  %p2041_p1 = por %p2040_p0, %p2039_p12 }
  0x3c   : > { %p2035_p9 = pneg %p2034_p7 }
  0x3e   : > { %p2042_p2 = pnand %p2041_p1, %p2035_p9 }
  0x40   : > { %2045 = shalt.err (!%p2042_p2)
}
  0x41   : > { %1869 = dma.hbm_to_vmem [thread:$0]  (!%p2313_p11), %s2677_s3, 512, %s2317_s6, [#allocation9], %s2683_s23, %s2683_s23, %s2684_s27  }
  0x42   : > { %s2046_s10 = scalar_lea.hbm %s2678_s4, 512 }
  0x43   : > { %p2047_p6 = scmp.ne.s32.totalorder %s2678_s4, %s2046_s10  ;;  %p2053_p5 = scmp.lt.u32.totalorder %s2046_s10, %s2678_s4 }
  0x45   : > { %p2049_p10 = pnand %p2047_p6, %p2329_p13 }
  0x47   : > { %p2050_p3 = pneg %p2049_p10 }
  0x49   : > { %p2055_p7 = pnand %p2053_p5, %p2050_p3 }
  0x4b   : > { %2058 = shalt.err (!%p2055_p7)
}
  0x4c   : > { %s2059_s16 = scalar_lea.vmem %s210_s8, 512  ;;  %p2067_p1 = scmp.lt.s32.totalorder %s210_s8, %s210_s8 }
  0x4d   : > { %p2060_p9 = scmp.ne.s32.totalorder %s210_s8, %s2059_s16  ;;  %p2068_p2 = scmp.lt.s32.totalorder %s2059_s16, %s2059_s16 }
  0x4f   : > { %p2062_p12 = pnand %p2060_p9, %p2329_p13  ;;  %p2069_p4 = por %p2068_p2, %p2067_p1 }
  0x51   : > { %p2063_p0 = pneg %p2062_p12 }
  0x53   : > { %p2070_p8 = pnand %p2069_p4, %p2063_p0 }
  0x55   : > { %2073 = shalt.err (!%p2070_p8)
}
  0x56   : > { %1872 = dma.hbm_to_vmem [thread:$0]  (!%p2313_p11), %s2678_s4, 512, %s210_s8, [#allocation9], %s2683_s23, %s2683_s23, %s2684_s27  }
  0x57   : > { %s2402_s14 = sadd.s32 1, %s2212_s21   ;;  %s32_s17 = sadd.s32 1, %s2208_s20 }
  0x58   : > { %s29_s29 = ssub.s32 %s2212_s21, %s2402_s14  ;;  %p39_p8 = scmp.ne.s32.totalorder %s2208_s20, %s2204_s19 }
  0x59   : > { %p30_p4 = scmp.eq.s32.totalorder %s29_s29, 0  ;;  %p40_p13 = scmp.eq.s32.totalorder %s2212_s21, 0 }
  0x5a   : > { %p1887_p6 = scmp.lt.s32.totalorder %s2212_s21, 2  ;;  %p2691_p3 = scmp.eq.s32.totalorder %s2283_s22, 1 }
  0x5b   : > { %s2412_s30 = scalar_select %p30_p4, %s2208_s20, %s32_s17  }
  0x5c   : > { %p41_p10 = por %p40_p13, %p39_p8  ;;  %p2416_p5 = por %p2691_p3, %p39_p8 }
  0x5d   : > { %s2421_s9 = sand.u32 1, %s2208_s20   ;;  %s1617_s8 = sshll.u32 %s2212_s21, 7 }
  0x5e   : > { %s1616_s10 = sshll.u32 %s2421_s9, 3  ;;  %s2693_s0 = sld [smem:[#allocation17_spill]] }
  0x5f   : > { %s227_s15 = scalar_lea.vmem [#allocation2], %s1616_s10  ;;  %p2430_p11 = pnand %p1887_p6, %p41_p10 }
  0x60   : > { %s234_s16 = sshll.u32 %s227_s15, 4  ;;  %s1618_s28 = sshll.u32 %s2421_s9, 4  ;;  %s2434_s16 = int_to_ptr.vmem [resolvable:$true] %s234_s16 }
  0x61   : > { %s224_s29 = scalar_lea.sflag [#allocation3], %s2421_s9  ;;  %p2076_p9 = pneg %p2430_p11 }
  0x64   : > { %s2428_s13 = scalar_lea.hbm %s2693_s0, %s1617_s8  ;;  %s2079_s11 = scalar_lea.hbm %s2693_s0, 256 }
  0x65   : > { %s2074_s17 = scalar_lea.hbm %s2428_s13, 128  ;;  %p2080_p1 = scmp.lt.u32.totalorder %s2428_s13, %s2693_s0 }
  0x66   : > { %p2075_p7 = scmp.ne.s32.totalorder %s2428_s13, %s2074_s17  ;;  %p2081_p2 = scmp.lt.u32.totalorder %s2079_s11, %s2074_s17 }
  0x67   : > { %p2083_p8 = scmp.lt.u32.totalorder %s2074_s17, %s2428_s13 }
  0x68   : > { %p2077_p12 = pnand %p2076_p9, %p2075_p7  ;;  %p2082_p4 = por %p2081_p2, %p2080_p1 }
  0x6a   : > { %p2078_p0 = pneg %p2077_p12  ;;  %p2084_p13 = por %p2083_p8, %p2082_p4 }
  0x6c   : > { %p2085_p6 = pnand %p2084_p13, %p2078_p0 }
  0x6e   : > { %2088 = shalt.err (!%p2085_p6)
}
  0x6f   : > { %s2089_s23 = scalar_lea.vmem %s2434_s16, 128  ;;  %s2219_s8 = smov [#allocation2]  }
  0x70   : > { %p2090_p10 = scmp.ne.s32.totalorder %s2434_s16, %s2089_s23  ;;  %s2094_s10 = sshll.u32 %s2219_s8, 4  ;;  %s2095_s10 = int_to_ptr.vmem [resolvable:$false] %s2094_s10 }
  0x71   : > { %s2096_s12 = scalar_lea.vmem %s2095_s10, 256  ;;  %p2097_p12 = scmp.lt.s32.totalorder %s2434_s16, %s2095_s10 }
  0x72   : > { %p2092_p3 = pnand %p2090_p10, %p2076_p9  ;;  %p2098_p1 = scmp.lt.s32.totalorder %s2096_s12, %s2089_s23 }
  0x74   : > { %p2093_p7 = pneg %p2092_p3  ;;  %p2099_p2 = por %p2098_p1, %p2097_p12 }
  0x76   : > { %p2100_p4 = pnand %p2099_p2, %p2093_p7 }
  0x78   : > { %2103 = shalt.err (!%p2100_p4)
}
  0x79   : > { %1876 = dma.hbm_to_vmem [thread:$0]  (!%p2430_p11), %s2428_s13, 128, %s2434_s16, %s224_s29  }
  0x7a   : > { %s245_s17 = scalar_lea.vmem [#allocation5], %s1618_s28  ;;  %s241_s15 = sand.u32 1, %s2212_s21  }
  0x7b   : > { %s252_s11 = sshll.u32 %s245_s17, 4  ;;  %s1655_s8 = sshll.u32 %s2212_s21, 8  ;;  %s2466_s11 = int_to_ptr.vmem [resolvable:$true] %s252_s11 }
  0x7c   : > { %s2472_s12 = scalar_lea.hbm %s2675_s1, %s1655_s8  ;;  %s2474_s27 = scalar_lea.sflag [#allocation6], %s241_s15 }
  0x7d   : > { %s2104_s0 = scalar_lea.hbm %s2472_s12, 256  ;;  %s2109_s16 = scalar_lea.hbm %s2675_s1, 512 }
  0x7e   : > { %p2105_p0 = scmp.ne.s32.totalorder %s2472_s12, %s2104_s0  ;;  %p2110_p6 = scmp.lt.u32.totalorder %s2472_s12, %s2675_s1 }
  0x7f   : > { %p2111_p10 = scmp.lt.u32.totalorder %s2109_s16, %s2104_s0  ;;  %p2113_p7 = scmp.lt.u32.totalorder %s2104_s0, %s2472_s12 }
  0x80   : > { %p2107_p8 = pnand %p2105_p0, %p2076_p9 }
  0x81   : > { %p2112_p3 = por %p2111_p10, %p2110_p6 }
  0x82   : > { %p2108_p13 = pneg %p2107_p8 }
  0x83   : > { %p2114_p12 = por %p2113_p7, %p2112_p3 }
  0x85   : > { %p2115_p1 = pnand %p2114_p12, %p2108_p13 }
  0x87   : > { %2118 = shalt.err (!%p2115_p1)
}
  0x88   : > { %s2119_s17 = scalar_lea.vmem %s2466_s11, 256  ;;  %s2220_s15 = smov [#allocation5]  }
  0x89   : > { %p2120_p2 = scmp.ne.s32.totalorder %s2466_s11, %s2119_s17  ;;  %s2124_s8 = sshll.u32 %s2220_s15, 4  ;;  %s2125_s8 = int_to_ptr.vmem [resolvable:$false] %s2124_s8 }
  0x8a   : > { %s2126_s23 = scalar_lea.vmem %s2125_s8, 512  ;;  %p2127_p8 = scmp.lt.s32.totalorder %s2466_s11, %s2125_s8 }
  0x8b   : > { %p2122_p4 = pnand %p2120_p2, %p2076_p9  ;;  %p2128_p6 = scmp.lt.s32.totalorder %s2126_s23, %s2119_s17 }
  0x8d   : > { %p2123_p0 = pneg %p2122_p4  ;;  %p2129_p10 = por %p2128_p6, %p2127_p8 }
  0x8f   : > { %p2130_p3 = pnand %p2129_p10, %p2123_p0 }
  0x91   : > { %2133 = shalt.err (!%p2130_p3)
}
  0x92   : > { %s2695_s0 = smov 8   ;;  %s2696_s10 = smov 128  }
  0x93   : > { %1879 = dma.hbm_to_vmem [thread:$0]  (!%p2430_p11), %s2472_s12, 256, %s2466_s11, %s2474_s27, %s2696_s10, %s2696_s10, %s2695_s0  }
  0x94   : > { %p2697_p9 = scmp.ne.s32.totalorder %s2688_s26, 0 }
  0x95   : > { %s2506_s9 = sand.u32 (!%p2697_p9), 1, %s2204_s19   ;;  %p2698_p13 = scmp.ne.s32.totalorder (!%p2697_p9), %s2686_s24, 0 }
  0x96   : > { %264 = sbr.rel (%p2697_p9) target bundleno = 2650 (0xa5a), region = 40  ;;  %s1622_s13 = sshll.u32 (!%p2697_p9), %s2506_s9, 3 }
  0x97   : > { %s267_s16 = scalar_lea.sflag (!%p2697_p9), [#allocation3], %s2506_s9  ;;  %s2512_s6 = scalar_lea.vmem (!%p2697_p9), [#allocation2], %s1622_s13 }
  0x9d   : > { %2179 = dma.done.wait (%p2698_p13), %s267_s16, 128  }
  0x9e   : > { %2181 = vsyncadd (%p2698_p13), %s267_s16, 4294967168  ;;  %s275_s26 = sand.u32 1, %s2283_s22   ;;  %s1623_s27 = sshll.u32 %s2506_s9, 4 }
  0x9f   : > { %s276_s11 = scalar_lea.sflag [#allocation6], %s275_s26  ;;  %s2520_s12 = scalar_lea.vmem [#allocation5], %s1623_s27 }
  0xa0   : > { %2183 = dma.done.wait (%p2698_p13), %s276_s11, 256  }
  0xa1   : > { %2185 = vsyncadd (%p2698_p13), %s276_s11, 4294967040  ;;  %p2699_p11 = scmp.eq.s32.totalorder %s2283_s22, 0 }
  0xa3   : > { %2187 = dma.done.wait (%p2699_p11), [#allocation6], 512   ;;  %p2700_p7 = pmov %p2699_p11 }
  0xa5   : > { %2189 = vsyncadd (%p2700_p7), [#allocation6], 4294966784  ;;  %p2701_p12 = pmov %p2700_p7 }
  0xa6   : > { %p2702_p1 = pmov %p2700_p7 }
  0xa7   : > { %2191 = dma.done.wait (%p2701_p12), [#allocation9], 1024  }
  0xa8   : > { %2193 = vsyncadd (%p2702_p1), [#allocation9], 4294966272  ;;  %v2221_v0 = vmov 0.0|0.0   ;;  %vm2222_vm0 = vmmov 0   ;;  %v2223_v1 = vmov 0.0   ;;  %vm330_vm1 = vcmask 261120  }
  0xa9   : > { %1797 = vmatprep.subr.bf16.mxu0 %v2221_v0  ;;  %1707 = vmatprep.mubr.msk.f32.mxu0 %vm2222_vm0, %v2223_v1  ;;  %v404_v2 = vld [vmem:[#allocation8] sm:$0xff]  ;;  %v405_v3 = vld [vmem:[#allocation8 + $0x8] sm:$0xff]  ;;  %v406_v4 = vld [vmem:[#allocation8 + $0x10] sm:$0xff]  ;;  %vm489_vm2 = vcmask 64512   ;;  %s2224_s24 = smov 96   ;;  %s2225_s28 = smov 120  }
  0xaa   : > { %v1803_v5 = vpack.c.bf16 %v405_v3, %v404_v2  ;;  %v407_v6 = vld [vmem:[#allocation8 + $0x18] sm:$0xff]  ;;  %v324_v7 = vld [vmem:[%s2520_s12] sm:$0xff]  ;;  %v327_v10 = vld [vmem:[#allocation7 + $0x8] sm:$0xff]  ;;  %vm569_vm4 = vcmask 130048   ;;  %s2226_s29 = smov 88   ;;  %s2227_s17 = smov 112  }
  0xab   : > { %v1807_v8 = vpack.c.bf16 %v407_v6, %v406_v4  ;;  %1718 = vmatprep.mubr.msk.f32.mxu1 %vm330_vm1, %v324_v7  ;;  %v326_v9 = vld [vmem:[#allocation7] sm:$0xff]  ;;  %v328_v11 = vld [vmem:[#allocation7 + $0x10] sm:$0xff]  ;;  %v329_v13 = vld [vmem:[#allocation7 + $0x18] sm:$0xff]  ;;  %s2228_s15 = smov 104   ;;  %s2229_s8 = smov 80  }
  0xac   : > { %1804 = vmatprep.subr.bf16.mxu1 %v1803_v5  ;;  %v1798_v12 = vpack.c.bf16 %v327_v10, %v326_v9  ;;  %v1801_v14 = vpack.c.bf16 %v329_v13, %v328_v11  ;;  %v325_v15 = vld [vmem:[%s2520_s12 + $0x8] sm:$0xff]  ;;  %vm2552_vm3 = vmpackc.low %vm489_vm2, %vm489_vm2  ;;  %v660_v10 = vld [vmem:[#allocation10] sm:$0xff]  ;;  %s2230_s23 = smov 72   ;;  %s1652_s0 = sshll.u32 %s2283_s22, 7 }
  0xad   : > { %1806 = vmatpush3.bf16.msra.mxu1 %v1803_v5  ;;  %v323_v16 = vld [vmem:[%s2512_s6] sm:$0xff]  ;;  %v833_v9 = vld [vmem:[#allocation10 + $0x8] sm:$0xff]  ;;  %s322_s10 = scalar_lea.vmem [#allocation11], %s1622_s13  ;;  %s2629_s27 = scalar_lea.hbm %s2679_s5, %s1652_s0 }
  0xae   : > { %1808 = vmatprep.subr.bf16.mxu1 %v1807_v8  ;;  %1799 = vmatpush3.bf16.msra.mxu0 %v1798_v12  ;;  %s1489_s16 = sshll.u32 %s322_s10, 4  ;;  %s1476_s11 = scalar_lea.sflag [#allocation4], %s2506_s9  ;;  %s2631_s16 = int_to_ptr.vmem [resolvable:$true] %s1489_s16 }
  0xaf   : > { %1800 = vmatprep.subr.bf16.mxu0 %v2221_v0  ;;  %s2134_s12 = scalar_lea.vmem %s2631_s16, 128  ;;  %s2231_s22 = smov [#allocation11]  }
  0xb0   : > { %p2135_p2 = scmp.ne.s32.totalorder %s2631_s16, %s2134_s12  ;;  %s2138_s13 = sshll.u32 %s2231_s22, 4  ;;  %s2139_s13 = int_to_ptr.vmem [resolvable:$false] %s2138_s13 }
  0xb1   : > { %1810 = vmatpush3.bf16.msra.mxu1 %v1807_v8  ;;  %p2141_p8 = scmp.lt.s32.totalorder %s2631_s16, %s2139_s13 }
  0xb2   : > { %1802 = vmatpush3.bf16.msra.mxu0 %v1801_v14  ;;  %1815 = vmatprep.subr.bf16.mxu1 %v2221_v0  ;;  %p2136_p4 = pnand %p2135_p2, %p2416_p5 }
  0xb3   : > { %1811 = vmatprep.subr.bf16.mxu0 %v2221_v0 }
  0xb4   : > { %1719 = vmatmul.mubr.msk.f32.vlgmr.msra.gmra.mrb[0].mxu1 %vm330_vm1, %v325_v15  ;;  %p2137_p0 = pneg %p2136_p4 }
  0xb5   : > { %1708 = vmatmul.mubr.msk.f32.vlgmr.msra.gmra.mrb[0].mxu0 %vm330_vm1, %v323_v16  ;;  %1732 = vmatprep.mubr.msk.f32.mxu1 %vm2222_vm0, %v2223_v1 }
  0xb6   : > { %1725 = vmatprep.mubr.msk.f32.mxu0 %vm2222_vm0, %v2223_v1 }
 0x187   : > { %v1720_v17 = vpop.f32.mrb[0].mxu1 }
 0x188   : > { %v480_v18 = vpop.f32.mrb[1].mxu1  ;;  %v400_v20 = vpop.f32.mrb[0].mxu0 }
 0x189   : > { %v2556_v21 = vpack.i.bf16 %v1720_v17, %v480_v18  ;;  %v1812_v22 = vpack.c.bf16 %v1720_v17, %v480_v18  ;;  %v1709_v23 = vpop.f32.mrb[1].mxu0 }
 0x18b   : > { %1940 = vrot.lane.b32.xlu1 %v2556_v21, %s2224_s24  ;;  %1814 = vmatpush3.bf16.xpose.msk.msra.mxu0 %vm2552_vm3, %v1812_v22  ;;  %s2140_s24 = scalar_lea.vmem %s2139_s13, 256 }
 0x18c   : > { %1749 = vmatprep.subr.mxu0 %v2223_v1  ;;  %p2142_p6 = scmp.lt.s32.totalorder %s2140_s24, %s2134_s12 }
 0x18e   : > { %p2143_p10 = por %p2142_p6, %p2141_p8 }
 0x18f   : > { %1945 = vrot.lane.b32.xlu1 %v2556_v21, %s2225_s28 }
 0x190   : > { %p2144_p3 = pnand %p2143_p10, %p2137_p0 }
 0x192   : > { %1726 = vmatmul.mubr.msk.f32.vlgmr.msra.gmra.mrb[2].mxu0 %vm489_vm2, %v400_v20 }
 0x193   : > { %1751 = vmatprep.mubr.msk.f32.mxu0 %vm2222_vm0, %v2223_v1  ;;  %1750 = vmatpush3.msra.mxu0 %v833_v9 }
 0x194   : > { %1754 = vmatprep.subr.mxu0 %v2223_v1 }
 0x1fd   : > { %v1941_v24 = vpop.permute.xlu1 %1940 }
 0x1fe   : > { %v1943_v25 = vunpack.i.h.bf16 %v1941_v24  ;;  %v1942_v26 = vunpack.i.l.bf16 %v1941_v24 }
 0x200   : > { %v1816_v27 = vpack.c.bf16 %v1943_v25, %v1942_v26 }
 0x201   : > { %v1946_v37 = vpop.permute.xlu1 %1945 }
 0x202   : > { %1817 = vmatpush3.bf16.msra.mxu1 %v1816_v27  ;;  %v1948_v38 = vunpack.i.h.bf16 %v1946_v37  ;;  %v1947_v39 = vunpack.i.l.bf16 %v1946_v37  ;;  %v1152_v37 = vld [vmem:[#allocation10 + $0x10] sm:$0xff] }
 0x203   : > { %1818 = vmatprep.subr.bf16.mxu1 %v2221_v0 }
 0x204   : > { %v1819_v42 = vpack.c.bf16 %v1948_v38, %v1947_v39 }
 0x265   : > { %v565_v28 = vpop.f32.mrb[2].mxu0 }
 0x266   : > { %v1727_v29 = vpop.f32.mrb[3].mxu0  ;;  %v570_v30 = vsel %vm569_vm4, %v565_v28, -inf }
 0x267   : > { %571 = vmax.xlane.f32.xlu0 %v570_v30 }
 0x2f4   : > { %v572_v31 = vpop.xlane.xlu0 %571 }
 0x2f5   : > { %v573_v32 = vsub.f32 %v565_v28, %v572_v31 }
 0x2f7   : > { %v574_v33 = vmul.f32 1.442695, %v573_v32 }
 0x2f9   : > { %1974 = vpow2.f32 %v574_v33 }
 0x303   : > { %v1975_v34 = vpop.eup %1974 }
 0x304   : > { %v576_v35 = vsel %vm569_vm4, %v1975_v34, 0.0 }
 0x305   : > { %577 = vadd.xlane.f32.xlu0 %v576_v35 }
 0x31b   : > { %661 = vrot.lane.b32.xlu0 %v400_v20, %s2225_s28 }
 0x392   : > { %v578_v36 = vpop.xlane.xlu0 %577 }
 0x393   : > { %1976 = vrcp.f32 %v578_v36 }
 0x396   : > { %v662_v43 = vpop.permute.xlu0 %661 }
 0x39d   : > { %v1977_v40 = vpop.eup %1976 }
 0x39e   : > { %v580_v41 = vmul.f32 %v1977_v40, %v1975_v34 }
 0x3a0   : > { %1733 = vmatmul.mubr.msk.f32.vlgmr.msra.gmra.mrb[2].mxu1 %vm569_vm4, %v580_v41 }
 0x3a1   : > { %1821 = vmatpush3.bf16.xpose.msk.msra.mxu1 %vm2552_vm3, %v1819_v42  ;;  %1739 = vmatprep.mubr.msk.f32.mxu1 %vm2222_vm0, %v2223_v1 }
 0x3a2   : > { %1822 = vmatprep.subr.bf16.mxu1 %v2221_v0 }
 0x3a8   : > { %1740 = vmatmul.mubr.msk.f32.vlgmr.msra.gmra.mrb[4].mxu1 %vm489_vm2, %v662_v43 }
 0x3a9   : > { %1746 = vmatprep.mubr.msk.f32.mxu1 %vm2222_vm0, %v2223_v1 }
 0x473   : > { %v656_v44 = vpop.f32.mrb[2].mxu1 }
 0x474   : > { %v1734_v45 = vpop.f32.mrb[3].mxu1 }
 0x47b   : > { %v739_v46 = vpop.f32.mrb[4].mxu1 }
 0x47c   : > { %v1741_v47 = vpop.f32.mrb[5].mxu1  ;;  %v743_v48 = vsel %vm569_vm4, %v739_v46, -inf }
 0x47d   : > { %744 = vmax.xlane.f32.xlu1 %v743_v48 }
 0x48e   : > { %1950 = vrot.lane.b32.xlu1 %v2556_v21, %s2226_s29 }
 0x492   : > { %980 = vrot.lane.b32.xlu1 %v400_v20, %s2227_s17 }
 0x496   : > { %1960 = vrot.lane.b32.xlu1 %v2556_v21, %s2228_s15 }
 0x49a   : > { %1227 = vrot.lane.b32.xlu1 %v400_v20, %s2228_s15 }
 0x50a   : > { %v745_v49 = vpop.xlane.xlu1 %744 }
 0x50b   : > { %v746_v50 = vsub.f32 %v739_v46, %v745_v49 }
 0x50d   : > { %v747_v51 = vmul.f32 1.442695, %v746_v50 }
 0x50e   : > { %v1951_v52 = vpop.permute.xlu1 %1950 }
 0x50f   : > { %1978 = vpow2.f32 %v747_v51  ;;  %v1953_v53 = vunpack.i.h.bf16 %v1951_v52  ;;  %v1952_v54 = vunpack.i.l.bf16 %v1951_v52 }
 0x511   : > { %v1823_v55 = vpack.c.bf16 %v1953_v53, %v1952_v54 }
 0x512   : > { %v981_v60 = vpop.permute.xlu1 %980 }
 0x513   : > { %1824 = vmatpush3.bf16.msra.mxu1 %v1823_v55 }
 0x514   : > { %1825 = vmatprep.subr.bf16.mxu1 %v2221_v0 }
 0x516   : > { %v1961_v4 = vpop.permute.xlu1 %1960 }
 0x517   : > { %v1963_v5 = vunpack.i.h.bf16 %v1961_v4  ;;  %v1962_v6 = vunpack.i.l.bf16 %v1961_v4 }
 0x519   : > { %v1979_v56 = vpop.eup %1978  ;;  %v1833_v7 = vpack.c.bf16 %v1963_v5, %v1962_v6 }
 0x51a   : > { %v749_v57 = vsel %vm569_vm4, %v1979_v56, 0.0  ;;  %v1228_v8 = vpop.permute.xlu1 %1227 }
 0x51b   : > { %750 = vadd.xlane.f32.xlu0 %v749_v57 }
 0x531   : > { %1955 = vrot.lane.b32.xlu0 %v2556_v21, %s2227_s17 }
 0x5a8   : > { %v751_v58 = vpop.xlane.xlu0 %750 }
 0x5a9   : > { %1980 = vrcp.f32 %v751_v58 }
 0x5ac   : > { %v1956_v59 = vpop.permute.xlu0 %1955 }
 0x5ad   : > { %v1958_v61 = vunpack.i.h.bf16 %v1956_v59  ;;  %v1957_v62 = vunpack.i.l.bf16 %v1956_v59 }
 0x5af   : > { %v1826_v3 = vpack.c.bf16 %v1958_v61, %v1957_v62 }
 0x5b3   : > { %v1981_v63 = vpop.eup %1980 }
 0x5b4   : > { %v753_v2 = vmul.f32 %v1981_v63, %v1979_v56 }
 0x5b6   : > { %1747 = vmatmul.mubr.msk.f32.vlgmr.msra.gmra.mrb[6].mxu1 %vm569_vm4, %v753_v2 }
 0x5b7   : > { %1828 = vmatpush3.bf16.xpose.msk.msra.mxu1 %vm2552_vm3, %v1826_v3  ;;  %1763 = vmatprep.mubr.msk.f32.mxu1 %vm2222_vm0, %v2223_v1 }
 0x5b8   : > { %1832 = vmatprep.subr.bf16.mxu1 %v2221_v0 }
 0x5be   : > { %1764 = vmatmul.mubr.msk.f32.vlgmr.msra.gmra.mrb[8].mxu1 %vm489_vm2, %v981_v60 }
 0x5bf   : > { %1835 = vmatpush3.bf16.xpose.msk.msra.mxu1 %vm2552_vm3, %v1833_v7  ;;  %1782 = vmatprep.mubr.msk.f32.mxu1 %vm2222_vm0, %v2223_v1 }
 0x5c6   : > { %1783 = vmatmul.mubr.msk.f32.vlgmr.msra.gmra.mrb[10].mxu1 %vm489_vm2, %v1228_v8 }
 0x689   : > { %v829_v11 = vpop.f32.mrb[6].mxu1 }
 0x68a   : > { %v1748_v12 = vpop.f32.mrb[7].mxu1  ;;  %1752 = vmatmul.mubr.msk.f32.vlgmr.msra.gmra.mrb[4].mxu0 %vm489_vm2, %v829_v11 }
 0x68b   : > { %1755 = vmatpush3.msra.mxu0 %v660_v10  ;;  %1756 = vmatprep.mubr.msk.f32.mxu0 %vm2222_vm0, %v2223_v1 }
 0x68c   : > { %1829 = vmatprep.subr.bf16.mxu0 %v2221_v0 }
 0x691   : > { %v1058_v13 = vpop.f32.mrb[8].mxu1 }
 0x692   : > { %v1765_v14 = vpop.f32.mrb[9].mxu1  ;;  %1757 = vmatmul.mubr.msk.f32.vlgmr.msra.gmra.mrb[4].mxu0 %vm489_vm2, %v656_v44  ;;  %v1062_v15 = vsel %vm569_vm4, %v1058_v13, -inf }
 0x693   : > { %1063 = vmax.xlane.f32.xlu1 %v1062_v15  ;;  %1770 = vmatprep.mubr.msk.f32.mxu0 %vm2222_vm0, %v2223_v1 }
 0x699   : > { %v1305_v16 = vpop.f32.mrb[10].mxu1 }
 0x69a   : > { %v1784_v17 = vpop.f32.mrb[11].mxu1  ;;  %v1309_v28 = vsel %vm569_vm4, %v1305_v16, -inf }
 0x6a4   : > { %1965 = vrot.lane.b32.xlu1 %v2556_v21, %s2229_s8 }
 0x720   : > { %v1064_v18 = vpop.xlane.xlu1 %1063 }
 0x721   : > { %v1065_v19 = vsub.f32 %v1058_v13, %v1064_v18 }
 0x723   : > { %v1066_v20 = vmul.f32 1.442695, %v1065_v19 }
 0x724   : > { %v1966_v22 = vpop.permute.xlu1 %1965 }
 0x725   : > { %1982 = vpow2.f32 %v1066_v20  ;;  %v1968_v23 = vunpack.i.h.bf16 %v1966_v22  ;;  %v1967_v24 = vunpack.i.l.bf16 %v1966_v22 }
 0x727   : > { %v1830_v25 = vpack.c.bf16 %v1968_v23, %v1967_v24 }
 0x729   : > { %1831 = vmatpush3.bf16.msra.mxu0 %v1830_v25 }
 0x72a   : > { %1773 = vmatprep.subr.mxu0 %v2223_v1 }
 0x72f   : > { %v1983_v26 = vpop.eup %1982 }
 0x730   : > { %v1068_v27 = vsel %vm569_vm4, %v1983_v26, 0.0 }
 0x731   : > { %1069 = vadd.xlane.f32.xlu0 %v1068_v27 }
 0x735   : > { %1310 = vmax.xlane.f32.xlu0 %v1309_v28 }
 0x7be   : > { %v1070_v29 = vpop.xlane.xlu0 %1069 }
 0x7bf   : > { %1984 = vrcp.f32 %v1070_v29 }
 0x7c2   : > { %v1311_v30 = vpop.xlane.xlu0 %1310 }
 0x7c3   : > { %v1312_v31 = vsub.f32 %v1305_v16, %v1311_v30 }
 0x7c5   : > { %v1313_v32 = vmul.f32 1.442695, %v1312_v31 }
 0x7c7   : > { %1986 = vpow2.f32 %v1313_v32 }
 0x7c9   : > { %v1985_v33 = vpop.eup %1984 }
 0x7ca   : > { %v1072_v34 = vmul.f32 %v1985_v33, %v1983_v26 }
 0x7cc   : > { %1771 = vmatmul.mubr.msk.f32.vlgmr.msra.gmra.mrb[6].mxu0 %vm569_vm4, %v1072_v34 }
 0x7cd   : > { %1775 = vmatprep.mubr.msk.f32.mxu0 %vm2222_vm0, %v2223_v1  ;;  %1774 = vmatpush3.msra.mxu0 %v1152_v37 }
 0x7ce   : > { %1836 = vmatprep.subr.bf16.mxu0 %v2221_v0  ;;  %v1399_v0 = vld [vmem:[#allocation10 + $0x18] sm:$0xff] }
 0x7d1   : > { %v1987_v35 = vpop.eup %1986 }
 0x7d2   : > { %v1315_v36 = vsel %vm569_vm4, %v1987_v35, 0.0 }
 0x7d3   : > { %1316 = vadd.xlane.f32.xlu0 %v1315_v36 }
 0x7e9   : > { %1970 = vrot.lane.b32.xlu0 %v2556_v21, %s2230_s23 }
 0x860   : > { %v1317_v38 = vpop.xlane.xlu0 %1316 }
 0x861   : > { %1988 = vrcp.f32 %v1317_v38 }
 0x864   : > { %v1971_v39 = vpop.permute.xlu0 %1970 }
 0x865   : > { %v1973_v40 = vunpack.i.h.bf16 %v1971_v39  ;;  %v1972_v41 = vunpack.i.l.bf16 %v1971_v39 }
 0x867   : > { %v1837_v43 = vpack.c.bf16 %v1973_v40, %v1972_v41 }
 0x86b   : > { %v1989_v42 = vpop.eup %1988 }
 0x86c   : > { %v1319_v21 = vmul.f32 %v1989_v42, %v1987_v35 }
 0x89f   : > { %v1148_v44 = vpop.f32.mrb[6].mxu0 }
 0x8a0   : > { %v1772_v45 = vpop.f32.mrb[7].mxu0  ;;  %1776 = vmatmul.mubr.msk.f32.vlgmr.msra.gmra.mrb[4].mxu0 %vm489_vm2, %v1148_v44 }
 0x8a1   : > { %1838 = vmatpush3.bf16.msra.mxu0 %v1837_v43  ;;  %1789 = vmatprep.mubr.msk.f32.mxu0 %vm2222_vm0, %v2223_v1 }
 0x8a2   : > { %1792 = vmatprep.subr.mxu0 %v2223_v1 }
 0x8a4   : > { %1790 = vmatmul.mubr.msk.f32.vlgmr.msra.gmra.mrb[8].mxu0 %vm569_vm4, %v1319_v21 }
 0x8a5   : > { %1793 = vmatpush3.msra.mxu0 %v1399_v0  ;;  %1794 = vmatprep.mubr.msk.f32.mxu0 %vm2222_vm0, %v2223_v1 }
 0x977   : > { %v1395_v46 = vpop.f32.mrb[8].mxu0 }
 0x978   : > { %v1791_v47 = vpop.f32.mrb[9].mxu0  ;;  %1795 = vmatmul.mubr.msk.f32.vlgmr.msra.gmra.mrb[4].mxu0 %vm489_vm2, %v1395_v46 }
 0xa4b   : > { %v1469_v48 = vpop.f32.mrb[4].mxu0 }
 0xa4c   : > { %1474 = vst.msk [vmem:[%s322_s10] sm:$0xff] %vm330_vm1, %v1469_v48  ;;  %v1796_v1 = vpop.f32.mrb[5].mxu0 }
 0xa4d   : > { %2147 = shalt.err (!%p2144_p3)
}
 0xa4e   : > { %s2148_s9 = scalar_lea.hbm %s2629_s27, 128  ;;  %s2152_s17 = scalar_lea.hbm %s2679_s5, 256 }
 0xa4f   : > { %p2149_p9 = scmp.ne.s32.totalorder %s2629_s27, %s2148_s9  ;;  %p2153_p7 = scmp.lt.u32.totalorder %s2629_s27, %s2679_s5 }
 0xa50   : > { %p2154_p12 = scmp.lt.u32.totalorder %s2152_s17, %s2148_s9  ;;  %p2156_p2 = scmp.lt.u32.totalorder %s2148_s9, %s2629_s27 }
 0xa51   : > { %p2150_p13 = pnand %p2149_p9, %p2416_p5 }
 0xa52   : > { %p2155_p1 = por %p2154_p12, %p2153_p7 }
 0xa53   : > { %p2151_p11 = pneg %p2150_p13 }
 0xa54   : > { %p2157_p4 = por %p2156_p2, %p2155_p1 }
 0xa56   : > { %p2158_p0 = pnand %p2157_p4, %p2151_p11 }
 0xa58   : > { %2161 = shalt.err (!%p2158_p0)
}
 0xa59   : > { %1861 = dma.vmem_to_hbm [thread:$0]  (%p2416_p5), %s2631_s16, 128, %s2629_s27, %s1476_s11  }
 0xa5a PF: > { %s1501_s23 = sand.u32 1, %s2200_s18   ;;  %p2705_p8 = scmp.ne.s32.totalorder %s2687_s25, 0 }
 0xa5b   : > { %p2706_p6 = scmp.ge.s32.totalorder %s2212_s21, 2  ;;  %s1502_s0 = scalar_lea.sflag [#allocation4], %s1501_s23 }
 0xa5d   : > { %p1881_p10 = pnand %p2706_p6, %p2705_p8 }
 0xa5f   : > { %2195 = dma.done.wait (!%p1881_p10), %s1502_s0, 128  }
 0xa60   : > { %2197 = vsyncadd (!%p1881_p10), %s1502_s0, 4294967168  ;;  %p22_p3 = scmp.ge.s32.totalorder %s2402_s14, 4   ;;  %s2707_s18 = smov %s2204_s19 }
 0xa61   : > { %s2708_s19 = smov %s2208_s20  ;;  %s2709_s20 = smov %s2412_s30 }
 0xa62   : > { %s2710_s21 = smov %s2402_s14  ;;  %24 = sbr.rel (!%p22_p3) target bundleno = 10 (0xa), region = 110 }
 0xa69   :  { %1507 = vsyncpa [#allocation3], 1 }
 0xa6a   :  { %1509 = vsyncpa [#allocation3 + $0x1], 1 }
 0xa6b   :  { %1510 = vsyncpa [#allocation6], 1 }
 0xa6c   :  { %1512 = vsyncpa [#allocation6 + $0x1], 1 }
 0xa6d   :  { %1513 = vsyncpa [#allocation9], 1 }
 0xa6e   :  { %1514 = vsyncpa [#allocation4], 1 }
 0xa6f   :  { %1516 = vsyncpa [#allocation4 + $0x1], 1 }

</bundles_post_ra>
